<compile_context>
chip_gen: v5e
topology: v5e:2x2
jax: 0.10.0
libtpu: 0.0.40
codegen_flags: <defaults>
</compile_context>

<pallas_src>
import functools

import jax
import jax.numpy as jnp
from jax.experimental import pallas as pl
from jax.experimental.pallas import tpu as pltpu


def _kl_kernel(ys_ref, yt_ref, out_ref, *, inv_T, eps):
    ys = ys_ref[...].astype(jnp.float32) * inv_T
    yt = yt_ref[...].astype(jnp.float32) * inv_T

    # Student log-softmax pieces: log_p_s = ys_sh - log_z_s.
    ys_sh = ys - jnp.max(ys, axis=-1, keepdims=True)
    log_z_s = jnp.log(jnp.sum(jnp.exp(ys_sh), axis=-1, keepdims=True))

    # Teacher softmax + eps (the module's "+ 10**-7").
    yt_sh = yt - jnp.max(yt, axis=-1, keepdims=True)
    exp_t = jnp.exp(yt_sh)
    inv_z_t = 1.0 / jnp.sum(exp_t, axis=-1, keepdims=True)  # one divide per row
    t = exp_t * inv_z_t + eps

    # KLDivLoss pointwise: t * (log t - log_p_s) = t * (log t - ys_sh + log_z_s).
    # t > 0 always (eps added), so no 0*log(0) select is needed.
    kl = t * (jnp.log(t) - ys_sh + log_z_s)

    # Only the class-axis (lane) reduction runs in the hot loop; cross-row sum
    # and the final T^2 / B scaling happen in plain JAX on (B, 1) partials.
    out_ref[...] = jnp.sum(kl, axis=-1, keepdims=True)


def _sublane_multiple(dtype):
    size = jnp.dtype(dtype).itemsize
    if size >= 4:
        return 8
    if size == 2:
        return 16
    return 32


def _vmem_plan():
    """(per-input-block byte budget, scoped vmem_limit_bytes), by generation."""
    cap = None
    try:
        info = pltpu.get_tpu_info()
        cap = int(getattr(info, "vmem_capacity_bytes", 0)) or None
    except Exception:
        cap = None
    if cap is not None and cap >= 100 * 1024 * 1024:
        # v5e / v6e: 128 MiB physical VMEM.  Big tiles (~85% of HBM roofline
        # per measured tiled-streaming data) + a generous scoped limit.
        return 4 * 1024 * 1024, 80 * 1024 * 1024
    # v7x (64 MiB per TensorCore) or unknown hardware: stay conservative so
    # 2 inputs x 2 pipeline buffers + f32 temporaries keep double buffering.
    return 2 * 1024 * 1024, 40 * 1024 * 1024


def _pick_batch_tile(B, C, dtype, block_budget_bytes):
    sub = _sublane_multiple(dtype)
    # Budget rows against the f32 working set (the f32 temporaries dominate
    # VMEM even when the streamed inputs are bf16).
    budget_rows = block_budget_bytes // max(1, C * 4)
    if B <= budget_rows:
        # Single full-batch block; full-extent dims are always a legal block.
        return B
    tb = (budget_rows // sub) * sub
    return max(sub, tb)


def kl_loss(y_s, y_t, temperature=3.0, *, batch_tile=None):
    """KD KL loss. y_s, y_t: (B, C) logits (f32 or bf16). Returns scalar f32."""
    assert y_s.shape == y_t.shape and y_s.ndim == 2
    B, C = y_s.shape
    itemsize = jnp.dtype(y_s.dtype).itemsize

    block_budget, vmem_limit = _vmem_plan()
    tb = (_pick_batch_tile(B, C, y_s.dtype, block_budget)
          if batch_tile is None else batch_tile)
    grid = (pl.cdiv(B, tb),)   # no B % tb requirement; boundary block is masked

    kernel = functools.partial(
        _kl_kernel, inv_T=1.0 / float(temperature), eps=1e-7
    )

    cost = pl.CostEstimate(
        flops=16 * B * C,
        transcendentals=3 * B * C + 2 * B,
        bytes_accessed=2 * B * C * itemsize + 4 * B,
    )

    row_kl = pl.pallas_call(
        kernel,
        out_shape=jax.ShapeDtypeStruct((B, 1), jnp.float32),
        grid_spec=pltpu.PrefetchScalarGridSpec(
            num_scalar_prefetch=0,
            grid=grid,
            in_specs=[
                pl.BlockSpec((tb, C), lambda i: (i, 0)),
                pl.BlockSpec((tb, C), lambda i: (i, 0)),
            ],
            out_specs=pl.BlockSpec((tb, 1), lambda i: (i, 0)),
        ),
        compiler_params=pltpu.CompilerParams(
            dimension_semantics=("parallel",),
            vmem_limit_bytes=vmem_limit,
        ),
        cost_estimate=cost,
    )(y_s, y_t)

    # Glue: cross-row sum + batchmean + T^2 scaling in plain JAX (tiny).
    return jnp.sum(row_kl) * (float(temperature) ** 2) / B


def _reference(y_s, y_t, T):
    y_s = y_s.astype(jnp.float32)
    y_t = y_t.astype(jnp.float32)
    log_p_s = jax.nn.log_softmax(y_s / T, axis=1)
    p_t = jax.nn.softmax(y_t / T, axis=1) + 1e-7
    kl = p_t * (jnp.log(p_t) - log_p_s)
    return T * T * jnp.sum(kl) / y_s.shape[0]


if __name__ == "__main__":
    key = jax.random.PRNGKey(0)
    k1, k2, k3, k4 = jax.random.split(key, 4)
    T = 3.0  # module default temperature

    # Case 1: small f32 logits (batch=8, num_classes=32).
    B, C = 8, 32
    y_s = jax.random.normal(k1, (B, C), dtype=jnp.float32)
    y_t = jax.random.normal(k2, (B, C), dtype=jnp.float32)
    loss = jax.block_until_ready(kl_loss(y_s, y_t, T))
    ref = _reference(y_s, y_t, T)
    assert jnp.allclose(loss, ref, rtol=1e-5, atol=1e-5), (loss, ref)

    # Case 2: batch not divisible by the tile — exercises the cdiv grid and
    # the masked boundary-block writeback (grid = 4 blocks of 16 rows for B=50).
    B2, C2 = 50, 160
    y_s2 = jax.random.normal(k3, (B2, C2), dtype=jnp.float32)
    y_t2 = jax.random.normal(k4, (B2, C2), dtype=jnp.float32)
    loss2 = jax.block_until_ready(kl_loss(y_s2, y_t2, T, batch_tile=16))
    ref2 = _reference(y_s2, y_t2, T)
    assert jnp.allclose(loss2, ref2, rtol=1e-5, atol=1e-5), (loss2, ref2)

    # Case 3: bf16 logits streamed from HBM (halves HBM traffic on v5e/v6e);
    # all math stays f32 inside the kernel.
    y_s3 = y_s.astype(jnp.bfloat16)
    y_t3 = y_t.astype(jnp.bfloat16)
    loss3 = jax.block_until_ready(kl_loss(y_s3, y_t3, T))
    ref3 = _reference(y_s3, y_t3, T)
    assert jnp.allclose(loss3, ref3, rtol=1e-5, atol=1e-5), (loss3, ref3)

    print("KERNEL_OK")
</pallas_src>

<mosaic_0001>
module attributes {stable_mosaic.version = 11 : i64} {
  func.func @_kl_kernel(%arg0: i32, %arg1: memref<8x32xf32, #tpu.memory_space<vmem>>, %arg2: memref<8x32xf32, #tpu.memory_space<vmem>>, %arg3: memref<8x1xf32, #tpu.memory_space<vmem>>) attributes {dimension_semantics = [#tpu.dimension_semantics<parallel>], iteration_bounds = array<i64: 1>, scalar_prefetch = 0 : i64, scratch_operands = 0 : i64, tpu.core_type = #tpu.core_type<tc>, window_params = [{transform_indices = @transform_0, window_bounds = array<i64: 8, 32>}, {transform_indices = @transform_1, window_bounds = array<i64: 8, 32>}, {transform_indices = @transform_2, window_bounds = array<i64: 8, 1>}]} {
    %c0 = arith.constant 0 : index
    %c0_0 = arith.constant 0 : index
    %0 = vector.load %arg1[%c0, %c0_0] : memref<8x32xf32, #tpu.memory_space<vmem>>, vector<8x32xf32>
    %cst = arith.constant 0.333333343 : f32
    %1 = vector.broadcast %cst : f32 to vector<8x32xf32>
    %2 = arith.mulf %0, %1 : vector<8x32xf32>
    %c0_1 = arith.constant 0 : index
    %c0_2 = arith.constant 0 : index
    %3 = vector.load %arg2[%c0_1, %c0_2] : memref<8x32xf32, #tpu.memory_space<vmem>>, vector<8x32xf32>
    %cst_3 = arith.constant 0.333333343 : f32
    %4 = vector.broadcast %cst_3 : f32 to vector<8x32xf32>
    %5 = arith.mulf %3, %4 : vector<8x32xf32>
    %cst_4 = arith.constant dense<0xFF800000> : vector<8xf32>
    %6 = vector.multi_reduction <maximumf>, %2, %cst_4 [1] : vector<8x32xf32> to vector<8xf32>
    %7 = vector.shape_cast %6 : vector<8xf32> to vector<8x1xf32>
    %8 = vector.broadcast %7 : vector<8x1xf32> to vector<8x32xf32>
    %9 = arith.subf %2, %8 : vector<8x32xf32>
    %10 = math.exp %9 : vector<8x32xf32>
    %cst_5 = arith.constant dense<0.000000e+00> : vector<8xf32>
    %11 = vector.multi_reduction <add>, %10, %cst_5 [1] : vector<8x32xf32> to vector<8xf32>
    %12 = vector.shape_cast %11 : vector<8xf32> to vector<8x1xf32>
    %13 = math.log %12 : vector<8x1xf32>
    %cst_6 = arith.constant dense<0xFF800000> : vector<8xf32>
    %14 = vector.multi_reduction <maximumf>, %5, %cst_6 [1] : vector<8x32xf32> to vector<8xf32>
    %15 = vector.shape_cast %14 : vector<8xf32> to vector<8x1xf32>
    %16 = vector.broadcast %15 : vector<8x1xf32> to vector<8x32xf32>
    %17 = arith.subf %5, %16 : vector<8x32xf32>
    %18 = math.exp %17 : vector<8x32xf32>
    %cst_7 = arith.constant dense<0.000000e+00> : vector<8xf32>
    %19 = vector.multi_reduction <add>, %18, %cst_7 [1] : vector<8x32xf32> to vector<8xf32>
    %20 = vector.shape_cast %19 : vector<8xf32> to vector<8x1xf32>
    %cst_8 = arith.constant 1.000000e+00 : f32
    %21 = vector.broadcast %cst_8 : f32 to vector<8x1xf32>
    %22 = arith.divf %21, %20 : vector<8x1xf32>
    %23 = vector.broadcast %22 : vector<8x1xf32> to vector<8x32xf32>
    %24 = arith.mulf %18, %23 : vector<8x32xf32>
    %cst_9 = arith.constant 1.000000e-07 : f32
    %25 = vector.broadcast %cst_9 : f32 to vector<8x32xf32>
    %26 = arith.addf %24, %25 : vector<8x32xf32>
    %27 = math.log %26 : vector<8x32xf32>
    %28 = arith.subf %27, %9 : vector<8x32xf32>
    %29 = vector.broadcast %13 : vector<8x1xf32> to vector<8x32xf32>
    %30 = arith.addf %28, %29 : vector<8x32xf32>
    %31 = arith.mulf %26, %30 : vector<8x32xf32>
    %cst_10 = arith.constant dense<0.000000e+00> : vector<8xf32>
    %32 = vector.multi_reduction <add>, %31, %cst_10 [1] : vector<8x32xf32> to vector<8xf32>
    %33 = vector.shape_cast %32 : vector<8xf32> to vector<8x1xf32>
    %c0_11 = arith.constant 0 : index
    %c0_12 = arith.constant 0 : index
    %34 = vector.load %arg3[%c0_11, %c0_12] : memref<8x1xf32, #tpu.memory_space<vmem>>, vector<8x1xf32>
    tpu.vector_store %arg3[%c0_11, %c0_12], %33 {strides = array<i32>} : memref<8x1xf32, #tpu.memory_space<vmem>>, vector<8x1xf32>,
    return
  }
  func.func @transform_0(%arg0: i32) -> (i32, i32) {
    %c0_i32 = arith.constant 0 : i32
    %c0_i32_0 = arith.constant 0 : i32
    return %arg0, %c0_i32 : i32, i32
  }
  func.func @transform_1(%arg0: i32) -> (i32, i32) {
    %c0_i32 = arith.constant 0 : i32
    %c0_i32_0 = arith.constant 0 : i32
    return %arg0, %c0_i32 : i32, i32
  }
  func.func @transform_2(%arg0: i32) -> (i32, i32) {
    %c0_i32 = arith.constant 0 : i32
    %c0_i32_0 = arith.constant 0 : i32
    return %arg0, %c0_i32 : i32, i32
  }
}

</mosaic_0001>

<bundles_post_ra>
// kernel: tpu_custom_call.1
= control target key start
LH: loop header
LB: loop body
LE: loop exit
PB: predicated region body
PF: predicated region fallthrough
CT: control target
= control target key end

     0   :  { %7 = vsyncpa [#allocation3], 0  ;;  %s192_s0 = inlined_call_operand.hbm [shape: f32[8,32], index: 0, kind: input, shape index: {}]   ;;  %s193_s1 = inlined_call_operand.hbm [shape: f32[8,32], index: 1, kind: input, shape index: {}]   ;;  %s194_s2 = inlined_call_operand.vmem [shape: f32[8,1], index: 2, kind: output, shape index: {}]  }
   0x1   :  { %s14_s11 = sshll.u32 %s192_s0, 4  ;;  %s15_s11 = int_to_ptr.hbm [resolvable:$true] %s14_s11 }
   0x2   :  { %8 = vsyncpa [#allocation5], 0  ;;  %s161_s12 = smov [#allocation2]   ;;  %s25_s16 = sshll.u32 %s193_s1, 4  ;;  %s26_s16 = int_to_ptr.hbm [resolvable:$true] %s25_s16 }
   0x3   :  { %s16_s13 = sshll.u32 %s161_s12, 4  ;;  %s162_s17 = smov [#allocation4]   ;;  %s17_s13 = int_to_ptr.vmem [resolvable:$true] %s16_s13 }
   0x4   :  { %19 = dma.hbm_to_vmem [thread:$0]  %s15_s11, 128, %s17_s13, [#allocation3]  }
   0x5   :  { %s27_s18 = sshll.u32 %s162_s17, 4  ;;  %s28_s18 = int_to_ptr.vmem [resolvable:$true] %s27_s18 }
   0x6   :  { %30 = dma.hbm_to_vmem [thread:$0]  %s26_s16, 128, %s28_s18, [#allocation5]  }
   0x7   :  { %157 = dma.done.wait [#allocation3], 128  }
   0x8   :  { %158 = vsyncadd [#allocation3], 4294967168 }
   0x9   :  { %159 = dma.done.wait [#allocation5], 128  }
   0xa   :  { %160 = vsyncadd [#allocation5], 4294967168  ;;  %v41_v0 = vld [vmem:[#allocation4] sm:$0xff]  ;;  %vm43_vm0 = vcmask 261120   ;;  %v39_v2 = vld [vmem:[#allocation2] sm:$0xff]  ;;  %vm89_vm5 = vcmask 7168  }
   0xb   :  { %v42_v1 = vmul.f32 0.33333334, %v41_v0  ;;  %v40_v4 = vmul.f32 0.33333334, %v39_v2 }
   0xd   :  { %v55_v3 = vsel %vm43_vm0, %v42_v1, -inf  ;;  %v44_v5 = vsel %vm43_vm0, %v40_v4, -inf }
   0xe   :  { %56 = vmax.xlane.f32.xlu0 %v55_v3 }
  0x16   :  { %45 = vmax.xlane.f32.xlu0 %v44_v5 }
  0x81   :  { %v57_v6 = vpop.xlane.xlu0 %56 }
  0x82   :  { %v58_v7 = vsub.f32 %v42_v1, %v57_v6 }
  0x84   :  { %v59_v8 = vmul.f32 1.442695, %v58_v7 }
  0x86   :  { %99 = vpow2.f32 %v59_v8 }
  0x89   :  { %v46_v9 = vpop.xlane.xlu0 %45 }
  0x8a   :  { %v47_v10 = vsub.f32 %v40_v4, %v46_v9 }
  0x8c   :  { %v100_v11 = vpop.eup %99  ;;  %v48_v12 = vmul.f32 1.442695, %v47_v10 }
  0x8d   :  { %v61_v13 = vsel %vm43_vm0, %v100_v11, 0.0 }
  0x8e   :  { %62 = vadd.xlane.f32.xlu1 %v61_v13  ;;  %101 = vpow2.f32 %v48_v12 }
  0x94   :  { %v102_v14 = vpop.eup %101 }
  0x95   :  { %v50_v15 = vsel %vm43_vm0, %v102_v14, 0.0 }
  0x96   :  { %51 = vadd.xlane.f32.xlu1 %v50_v15 }
 0x101   :  { %v63_v16 = vpop.xlane.xlu1 %62 }
 0x102   :  { %103 = vrcp.f32 %v63_v16  ;;  %v75_v20 = vand.u32 2147483648, %v63_v16  ;;  %v73_v22 = vand.u32 2147483647, %v63_v16  ;;  %vm69_vm2 = vweird.f32 %v63_v16 }
 0x104   :  { %v76_v24 = vor.u32 1.1754944e-38, %v75_v20  ;;  %vm74_vm4 = vcmp.eq.f32.partialorder %v73_v22, 8.507059e+37 }
 0x108   :  { %v104_v17 = vpop.eup %103 }
 0x109   :  { %v65_v18 = vmul.f32 %v104_v17, %v63_v16  ;;  %vm70_vm1 = vweird.f32 %v104_v17  ;;  %v52_v27 = vpop.xlane.xlu1 %51 }
 0x10a   :  { %vm71_vm3 = vmor %vm69_vm2, %vm70_vm1  ;;  %105 = vlog2.f32 %v52_v27 }
 0x10b   :  { %v66_v19 = vsub.f32 1.0, %v65_v18 }
 0x10d   :  { %v67_v21 = vmul.f32 %v104_v17, %v66_v19 }
 0x10f   :  { %v68_v23 = vadd.f32 %v104_v17, %v67_v21 }
 0x110   :  { %v106_v30 = vpop.eup %105 }
 0x111   :  { %v72_v25 = vsel %vm71_vm3, %v104_v17, %v68_v23  ;;  %v54_v33 = vmul.f32 0.6931472, %v106_v30 }
 0x112   :  { %v77_v26 = vsel %vm74_vm4, %v76_v24, %v72_v25 }
 0x113   :  { %v79_v28 = vmul.f32 %v100_v11, %v77_v26 }
 0x115   :  { %v80_v29 = vadd.f32 1e-07, %v79_v28 }
 0x117   :  { %107 = vlog2.f32 %v80_v29 }
 0x11d   :  { %v108_v31 = vpop.eup %107 }
 0x11e   :  { %v82_v32 = vmul.f32 0.6931472, %v108_v31 }
 0x120   :  { %v83_v34 = vsub.f32 %v82_v32, %v47_v10 }
 0x122   :  { %v84_v35 = vadd.f32 %v83_v34, %v54_v33 }
 0x124   :  { %v85_v36 = vmul.f32 %v84_v35, %v80_v29 }
 0x126   :  { %v86_v37 = vsel %vm43_vm0, %v85_v36, 0.0 }
 0x127   :  { %87 = vadd.xlane.f32.xlu2 %v86_v37 }
 0x19a   :  { %v88_v38 = vpop.xlane.xlu2 %87 }
 0x19b   :  { %90 = vst.msk [vmem:[%s194_s2] sm:$0xff] %vm89_vm5, %v88_v38 }
 0x19c   :  { %95 = vsyncpa [#allocation3], 1 }
 0x19d   :  { %96 = vsyncpa [#allocation5], 1 }

</bundles_post_ra>
